<compile_context>
chip_gen: v7x
topology: tpu7x:2x2x1
jax: 0.10.0
libtpu: 0.0.40
codegen_flags: <defaults>
</compile_context>

<pallas_src>
import functools

import jax
import jax.numpy as jnp
from jax.experimental import pallas as pl
from jax.experimental.pallas import tpu as pltpu

_LANE = 128          # lane width: output padded to a multiple of this
_SUBLANE_ALIGN = 16  # batch-tile alignment (valid for bf16 and f32 tiles)


def _round_up(x, m):
    return (x + m - 1) // m * m


def _vmem_capacity_bytes():
    try:
        return int(pltpu.get_tpu_info().vmem_capacity_bytes)
    except Exception:
        return 64 * 1024 * 1024  # conservative (v7x per-TC)


# -----------------------------------------------------------------------------
# Kernels
# -----------------------------------------------------------------------------
def _mlp_kernel_2layer(x_ref, w1_ref, b1_ref, w2_ref, b2_ref, w3_ref, b3_ref,
                       o_ref, *, scale, tanh_flag):
    cd = w1_ref.dtype  # MXU input dtype (bf16 in production, f32 for checks)
    h = jnp.dot(x_ref[...], w1_ref[...], preferred_element_type=jnp.float32)
    h = jnp.maximum(h + b1_ref[...], 0.0)
    h = jnp.dot(h.astype(cd), w2_ref[...], preferred_element_type=jnp.float32)
    h = jnp.maximum(h + b2_ref[...], 0.0)
    o = jnp.dot(h.astype(cd), w3_ref[...],
                preferred_element_type=jnp.float32) + b3_ref[...]
    if tanh_flag:
        # scale must follow tanh; when tanh_flag is False it has already been
        # folded into w3/b3 at prepare time.
        o = jnp.tanh(o) * scale
    o_ref[...] = o.astype(o_ref.dtype)


def _mlp_kernel_1layer(x_ref, w1_ref, b1_ref, w3_ref, b3_ref,
                       o_ref, *, scale, tanh_flag):
    cd = w1_ref.dtype
    h = jnp.dot(x_ref[...], w1_ref[...], preferred_element_type=jnp.float32)
    h = jnp.maximum(h + b1_ref[...], 0.0)
    o = jnp.dot(h.astype(cd), w3_ref[...],
                preferred_element_type=jnp.float32) + b3_ref[...]
    if tanh_flag:
        o = jnp.tanh(o) * scale
    o_ref[...] = o.astype(o_ref.dtype)


# -----------------------------------------------------------------------------
# Parameter init (mirrors the PyTorch module's __init__)
# -----------------------------------------------------------------------------
def init_mlp_params(key, input_size, output_size, hidden_size, n_layers=1):
    """Weights already transposed to [in, out]; biases as [1, out]."""
    keys = jax.random.split(key, 8)
    params = {}

    v1 = 1.0 / jnp.sqrt(jnp.float32(input_size))
    params["w1"] = jax.random.uniform(
        keys[0], (input_size, hidden_size), jnp.float32, -v1, v1)
    params["b1"] = jax.random.uniform(
        keys[1], (1, hidden_size), jnp.float32, -v1, v1)

    if n_layers == 2:
        v2 = 1.0 / jnp.sqrt(jnp.float32(hidden_size))
        params["w2"] = jax.random.uniform(
            keys[2], (hidden_size, hidden_size), jnp.float32, -v2, v2)
        params["b2"] = jax.random.uniform(
            keys[3], (1, hidden_size), jnp.float32, -v2, v2)

    params["w3"] = jax.random.uniform(
        keys[4], (hidden_size, output_size), jnp.float32, -0.003, 0.003)
    params["b3"] = jax.random.uniform(
        keys[5], (1, output_size), jnp.float32, -0.003, 0.003)
    return params


# -----------------------------------------------------------------------------
# One-time weight preparation (hoisted out of the per-call path)
# -----------------------------------------------------------------------------
def prepare_mlp(params, *, n_layers=1, scale=1.0, tanh_flag=0,
                compute_dtype=jnp.bfloat16):
    """Cast / scale-fold / lane-pad the weights ONCE; reuse across forwards."""
    cd = jnp.dtype(compute_dtype)
    scale = float(scale)
    tanh_flag = bool(tanh_flag)

    H = params["w1"].shape[1]
    N = params["w3"].shape[1]
    N_pad = _round_up(N, _LANE)  # lane-dense (unmasked vst) output store

    w1 = params["w1"].astype(cd)
    b1 = params["b1"].astype(jnp.float32)
    w3 = params["w3"].astype(jnp.float32)
    b3 = params["b3"].astype(jnp.float32)
    if (not tanh_flag) and scale != 1.0:
        # Fold scale into the last linear layer (exact: no tanh in between).
        w3 = w3 * scale
        b3 = b3 * scale
    if N_pad != N:
        w3 = jnp.pad(w3, ((0, 0), (0, N_pad - N)))
        b3 = jnp.pad(b3, ((0, 0), (0, N_pad - N)))
    w3 = w3.astype(cd)

    weights = [w1, b1]
    if n_layers == 2:
        weights += [params["w2"].astype(cd), params["b2"].astype(jnp.float32)]
    weights += [w3, b3]

    return dict(weights=tuple(weights), n_layers=n_layers, scale=scale,
                tanh_flag=tanh_flag, compute_dtype=cd,
                hidden=H, n_out=N, n_pad=N_pad)


# -----------------------------------------------------------------------------
# Forward
# -----------------------------------------------------------------------------
def mlp_forward_prepared(x, prepped, *, tile_b=None, out_dtype=None):
    """Fused MLP forward: batch-tiled, single-buffered VMEM-resident weights."""
    B, D_in = x.shape
    cd = prepped["compute_dtype"]
    H, N, N_pad = prepped["hidden"], prepped["n_out"], prepped["n_pad"]
    weights = prepped["weights"]
    n_layers = prepped["n_layers"]
    scale = prepped["scale"]
    tanh_flag = prepped["tanh_flag"]
    out_dtype = jnp.dtype(out_dtype) if out_dtype is not None else x.dtype

    # Activations in compute dtype end-to-end (halves recurring x HBM read).
    x_cd = x.astype(cd)

    weight_bytes = sum(int(w.size) * w.dtype.itemsize for w in weights)
    x_ib = jnp.dtype(cd).itemsize
    o_ib = jnp.dtype(out_dtype).itemsize

    cap = _vmem_capacity_bytes()
    budget = int(cap * 0.7)

    def footprint(tb):
        return (weight_bytes                      # single-buffered weights
                + 2 * tb * D_in * x_ib            # double-buffered x tiles
                + 2 * tb * N_pad * o_ib           # double-buffered out tiles
                + 3 * tb * max(H, N_pad) * 4)     # f32 live intermediates

    if tile_b is None:
        tb = min(2048, _round_up(B, _SUBLANE_ALIGN))
        # Shrink until the footprint fits the per-chip VMEM budget.
        while tb > _SUBLANE_ALIGN and footprint(tb) > budget:
            tb = max(_SUBLANE_ALIGN, _round_up(tb // 2, _SUBLANE_ALIGN))
        # Guarantee >=2 grid steps when the batch allows it (v7x megacore).
        b_al = _round_up(B, _SUBLANE_ALIGN)
        if tb >= b_al and b_al >= 2 * _SUBLANE_ALIGN:
            tb = _round_up(pl.cdiv(b_al, 2), _SUBLANE_ALIGN)
        tile_b = tb
    tile_b = max(_SUBLANE_ALIGN, _round_up(int(tile_b), _SUBLANE_ALIGN))

    B_pad = _round_up(B, tile_b)
    grid = (B_pad // tile_b,)
    x_p = jnp.pad(x_cd, ((0, B_pad - B), (0, 0))) if B_pad != B else x_cd

    if n_layers == 2:
        kernel = functools.partial(_mlp_kernel_2layer,
                                   scale=scale, tanh_flag=tanh_flag)
    else:
        kernel = functools.partial(_mlp_kernel_1layer,
                                   scale=scale, tanh_flag=tanh_flag)

    flops = 2 * B_pad * (D_in * H + (H * H if n_layers == 2 else 0) + H * N_pad)
    cost = pl.CostEstimate(
        flops=int(flops),
        transcendentals=int(B_pad * N_pad) if tanh_flag else 0,
        bytes_accessed=int(weight_bytes + B_pad * D_in * x_ib
                           + B_pad * N_pad * o_ib))

    vmem_limit = int(min(max(footprint(tile_b) + (2 << 20), 8 << 20),
                         int(cap * 0.9)))

    def _build_and_run(single_buffer_weights):
        def w_spec(a):
            nd = a.ndim
            idx = lambda i, _nd=nd: (0,) * _nd  # constant block index
            if single_buffer_weights:
                return pl.BlockSpec(a.shape, idx, pipeline_mode=pl.Buffered(1))
            return pl.BlockSpec(a.shape, idx)

        in_specs = [pl.BlockSpec((tile_b, D_in), lambda i: (i, 0))]
        in_specs += [w_spec(w) for w in weights]
        out_specs = pl.BlockSpec((tile_b, N_pad), lambda i: (i, 0))

        return pl.pallas_call(
            kernel,
            out_shape=jax.ShapeDtypeStruct((B_pad, N_pad), out_dtype),
            grid=grid,
            in_specs=in_specs,
            out_specs=out_specs,
            compiler_params=pltpu.CompilerParams(
                dimension_semantics=("parallel",),  # megacore on v7x
                vmem_limit_bytes=vmem_limit),
            cost_estimate=cost,
        )(x_p, *weights)

    try:
        out = _build_and_run(True)
    except Exception:
        # Buffered(1) not supported by this JAX build: fall back to default
        # double-buffered weight blocks (correct, just wastes some VMEM).
        out = _build_and_run(False)

    return out[:B, :N]


def mlp_forward(x, params, *, n_layers=1, scale=1.0, tanh_flag=0,
                compute_dtype=jnp.bfloat16, tile_b=None):
    """Convenience one-shot wrapper (prep + forward). Prefer prepare_mlp once."""
    prepped = prepare_mlp(params, n_layers=n_layers, scale=scale,
                          tanh_flag=tanh_flag, compute_dtype=compute_dtype)
    return mlp_forward_prepared(x, prepped, tile_b=tile_b)


def mlp_forward_ref(x, params, *, n_layers=1, scale=1.0, tanh_flag=0):
    """Pure-JAX reference (matches PyTorch forward semantics)."""
    h = jnp.maximum(x @ params["w1"] + params["b1"], 0.0)
    if n_layers == 2:
        h = jnp.maximum(h @ params["w2"] + params["b2"], 0.0)
    o = h @ params["w3"] + params["b3"]
    if tanh_flag:
        o = jnp.tanh(o)
    return scale * o


if __name__ == "__main__":
    # Small shapes consistent with the module: batch=8, input=16, hidden=32, out=8
    B, input_size, hidden_size, output_size = 8, 16, 32, 8
    key = jax.random.PRNGKey(0)
    pkey, xkey = jax.random.split(key)

    for n_layers, scale, tanh_flag in [(2, 2.0, 1), (1, 0.5, 0)]:
        params = init_mlp_params(pkey, input_size, output_size, hidden_size,
                                 n_layers=n_layers)
        x = jax.random.normal(xkey, (B, input_size), jnp.float32)
        ref = mlp_forward_ref(x, params, n_layers=n_layers, scale=scale,
                              tanh_flag=tanh_flag)

        # Production path: bf16 MXU + f32 accumulation, hoisted weight prep.
        prepped = prepare_mlp(params, n_layers=n_layers, scale=scale,
                              tanh_flag=tanh_flag)
        out = jax.block_until_ready(mlp_forward_prepared(x, prepped))
        assert out.shape == (B, output_size)
        assert out.dtype == x.dtype
        assert jnp.allclose(out, ref, atol=5e-3, rtol=5e-2)

        # f32 path: verification only (never ship; MXU f32 is slow/emulated).
        prepped32 = prepare_mlp(params, n_layers=n_layers, scale=scale,
                                tanh_flag=tanh_flag, compute_dtype=jnp.float32)
        out32 = jax.block_until_ready(mlp_forward_prepared(x, prepped32))
        assert jnp.allclose(out32, ref, atol=1e-4, rtol=1e-4)

    # Multi-tile grid path: batch not divisible by the tile, explicit tile_b,
    # exercises the pipelined batch grid, >=2 grid steps, padding and slicing.
    B2 = 300
    params = init_mlp_params(pkey, input_size, output_size, hidden_size,
                             n_layers=2)
    x2 = jax.random.normal(xkey, (B2, input_size), jnp.float32)
    ref2 = mlp_forward_ref(x2, params, n_layers=2, scale=2.0, tanh_flag=1)
    prepped = prepare_mlp(params, n_layers=2, scale=2.0, tanh_flag=1)
    out2 = jax.block_until_ready(mlp_forward_prepared(x2, prepped, tile_b=128))
    assert out2.shape == (B2, output_size)
    assert jnp.allclose(out2, ref2, atol=5e-3, rtol=5e-2)

    # Auto tile_b path (derived from VMEM cap, >=2 grid steps).
    out2_auto = jax.block_until_ready(mlp_forward_prepared(x2, prepped))
    assert jnp.allclose(out2_auto, ref2, atol=5e-3, rtol=5e-2)

    print("KERNEL_OK")
</pallas_src>

<mosaic_0001>
module attributes {stable_mosaic.version = 11 : i64} {
  func.func @_mlp_kernel_2layer(%arg0: i32, %arg1: memref<16x16xbf16, #tpu.memory_space<vmem>>, %arg2: memref<16x32xbf16, #tpu.memory_space<vmem>>, %arg3: memref<1x32xf32, #tpu.memory_space<vmem>>, %arg4: memref<32x32xbf16, #tpu.memory_space<vmem>>, %arg5: memref<1x32xf32, #tpu.memory_space<vmem>>, %arg6: memref<32x128xbf16, #tpu.memory_space<vmem>>, %arg7: memref<1x128xf32, #tpu.memory_space<vmem>>, %arg8: memref<16x128xf32, #tpu.memory_space<vmem>>) attributes {dimension_semantics = [#tpu.dimension_semantics<parallel>], iteration_bounds = array<i64: 1>, scalar_prefetch = 0 : i64, scratch_operands = 0 : i64, tpu.core_type = #tpu.core_type<tc>, window_params = [{transform_indices = @transform_0, window_bounds = array<i64: 16, 16>}, {pipeline_mode = #tpu.pipeline_mode<synchronous>, transform_indices = @transform_1, window_bounds = array<i64: 16, 32>}, {pipeline_mode = #tpu.pipeline_mode<synchronous>, transform_indices = @transform_2, window_bounds = array<i64: 1, 32>}, {pipeline_mode = #tpu.pipeline_mode<synchronous>, transform_indices = @transform_3, window_bounds = array<i64: 32, 32>}, {pipeline_mode = #tpu.pipeline_mode<synchronous>, transform_indices = @transform_4, window_bounds = array<i64: 1, 32>}, {pipeline_mode = #tpu.pipeline_mode<synchronous>, transform_indices = @transform_5, window_bounds = array<i64: 32, 128>}, {pipeline_mode = #tpu.pipeline_mode<synchronous>, transform_indices = @transform_6, window_bounds = array<i64: 1, 128>}, {transform_indices = @transform_7, window_bounds = array<i64: 16, 128>}]} {
    %c0 = arith.constant 0 : index
    %c0_0 = arith.constant 0 : index
    %0 = vector.load %arg1[%c0, %c0_0] : memref<16x16xbf16, #tpu.memory_space<vmem>>, vector<16x16xbf16>
    %c0_1 = arith.constant 0 : index
    %c0_2 = arith.constant 0 : index
    %1 = vector.load %arg2[%c0_1, %c0_2] : memref<16x32xbf16, #tpu.memory_space<vmem>>, vector<16x32xbf16>
    %cst = arith.constant dense<0.000000e+00> : vector<16x32xf32>
    %2 = tpu.matmul %0, %1, %cst {dimension_numbers = #tpu.dot_dimension_numbers<[1], [0], [0], [1], [0, 0, 1, 1], [], []>} : vector<16x16xbf16>, vector<16x32xbf16>, vector<16x32xf32> -> vector<16x32xf32>
    %c0_3 = arith.constant 0 : index
    %c0_4 = arith.constant 0 : index
    %3 = vector.load %arg3[%c0_3, %c0_4] : memref<1x32xf32, #tpu.memory_space<vmem>>, vector<1x32xf32>
    %4 = vector.broadcast %3 : vector<1x32xf32> to vector<16x32xf32>
    %5 = arith.addf %2, %4 : vector<16x32xf32>
    %cst_5 = arith.constant 0.000000e+00 : f32
    %6 = vector.broadcast %cst_5 : f32 to vector<16x32xf32>
    %7 = arith.maximumf %5, %6 : vector<16x32xf32>
    %8 = arith.truncf %7 : vector<16x32xf32> to vector<16x32xbf16>
    %c0_6 = arith.constant 0 : index
    %c0_7 = arith.constant 0 : index
    %9 = vector.load %arg4[%c0_6, %c0_7] : memref<32x32xbf16, #tpu.memory_space<vmem>>, vector<32x32xbf16>
    %cst_8 = arith.constant dense<0.000000e+00> : vector<16x32xf32>
    %10 = tpu.matmul %8, %9, %cst_8 {dimension_numbers = #tpu.dot_dimension_numbers<[1], [0], [0], [1], [0, 0, 1, 1], [], []>} : vector<16x32xbf16>, vector<32x32xbf16>, vector<16x32xf32> -> vector<16x32xf32>
    %c0_9 = arith.constant 0 : index
    %c0_10 = arith.constant 0 : index
    %11 = vector.load %arg5[%c0_9, %c0_10] : memref<1x32xf32, #tpu.memory_space<vmem>>, vector<1x32xf32>
    %12 = vector.broadcast %11 : vector<1x32xf32> to vector<16x32xf32>
    %13 = arith.addf %10, %12 : vector<16x32xf32>
    %cst_11 = arith.constant 0.000000e+00 : f32
    %14 = vector.broadcast %cst_11 : f32 to vector<16x32xf32>
    %15 = arith.maximumf %13, %14 : vector<16x32xf32>
    %16 = arith.truncf %15 : vector<16x32xf32> to vector<16x32xbf16>
    %c0_12 = arith.constant 0 : index
    %c0_13 = arith.constant 0 : index
    %17 = vector.load %arg6[%c0_12, %c0_13] : memref<32x128xbf16, #tpu.memory_space<vmem>>, vector<32x128xbf16>
    %cst_14 = arith.constant dense<0.000000e+00> : vector<16x128xf32>
    %18 = tpu.matmul %16, %17, %cst_14 {dimension_numbers = #tpu.dot_dimension_numbers<[1], [0], [0], [1], [0, 0, 1, 1], [], []>} : vector<16x32xbf16>, vector<32x128xbf16>, vector<16x128xf32> -> vector<16x128xf32>
    %c0_15 = arith.constant 0 : index
    %c0_16 = arith.constant 0 : index
    %19 = vector.load %arg7[%c0_15, %c0_16] : memref<1x128xf32, #tpu.memory_space<vmem>>, vector<1x128xf32>
    %20 = vector.broadcast %19 : vector<1x128xf32> to vector<16x128xf32>
    %21 = arith.addf %18, %20 : vector<16x128xf32>
    %22 = math.tanh %21 : vector<16x128xf32>
    %cst_17 = arith.constant 2.000000e+00 : f32
    %23 = vector.broadcast %cst_17 : f32 to vector<16x128xf32>
    %24 = arith.mulf %22, %23 : vector<16x128xf32>
    %c0_18 = arith.constant 0 : index
    %c0_19 = arith.constant 0 : index
    %25 = vector.load %arg8[%c0_18, %c0_19] : memref<16x128xf32, #tpu.memory_space<vmem>>, vector<16x128xf32>
    tpu.vector_store %arg8[%c0_18, %c0_19], %24 {strides = array<i32>} : memref<16x128xf32, #tpu.memory_space<vmem>>, vector<16x128xf32>,
    return
  }
  func.func @transform_0(%arg0: i32) -> (i32, i32) {
    %c0_i32 = arith.constant 0 : i32
    %c0_i32_0 = arith.constant 0 : i32
    return %arg0, %c0_i32 : i32, i32
  }
  func.func @transform_1(%arg0: i32) -> (i32, i32) {
    %c0_i32 = arith.constant 0 : i32
    %c0_i32_0 = arith.constant 0 : i32
    %c0_i32_1 = arith.constant 0 : i32
    return %c0_i32, %c0_i32_0 : i32, i32
  }
  func.func @transform_2(%arg0: i32) -> (i32, i32) {
    %c0_i32 = arith.constant 0 : i32
    %c0_i32_0 = arith.constant 0 : i32
    %c0_i32_1 = arith.constant 0 : i32
    return %c0_i32, %c0_i32_0 : i32, i32
  }
  func.func @transform_3(%arg0: i32) -> (i32, i32) {
    %c0_i32 = arith.constant 0 : i32
    %c0_i32_0 = arith.constant 0 : i32
    %c0_i32_1 = arith.constant 0 : i32
    return %c0_i32, %c0_i32_0 : i32, i32
  }
  func.func @transform_4(%arg0: i32) -> (i32, i32) {
    %c0_i32 = arith.constant 0 : i32
    %c0_i32_0 = arith.constant 0 : i32
    %c0_i32_1 = arith.constant 0 : i32
    return %c0_i32, %c0_i32_0 : i32, i32
  }
  func.func @transform_5(%arg0: i32) -> (i32, i32) {
    %c0_i32 = arith.constant 0 : i32
    %c0_i32_0 = arith.constant 0 : i32
    %c0_i32_1 = arith.constant 0 : i32
    return %c0_i32, %c0_i32_0 : i32, i32
  }
  func.func @transform_6(%arg0: i32) -> (i32, i32) {
    %c0_i32 = arith.constant 0 : i32
    %c0_i32_0 = arith.constant 0 : i32
    %c0_i32_1 = arith.constant 0 : i32
    return %c0_i32, %c0_i32_0 : i32, i32
  }
  func.func @transform_7(%arg0: i32) -> (i32, i32) {
    %c0_i32 = arith.constant 0 : i32
    %c0_i32_0 = arith.constant 0 : i32
    return %arg0, %c0_i32 : i32, i32
  }
}

module attributes {stable_mosaic.version = 11 : i64} {
  func.func @_mlp_kernel_2layer(%arg0: i32, %arg1: memref<16x16xbf16, #tpu.memory_space<vmem>>, %arg2: memref<16x32xbf16, #tpu.memory_space<vmem>>, %arg3: memref<1x32xf32, #tpu.memory_space<vmem>>, %arg4: memref<32x32xbf16, #tpu.memory_space<vmem>>, %arg5: memref<1x32xf32, #tpu.memory_space<vmem>>, %arg6: memref<32x128xbf16, #tpu.memory_space<vmem>>, %arg7: memref<1x128xf32, #tpu.memory_space<vmem>>, %arg8: memref<16x128xf32, #tpu.memory_space<vmem>>) attributes {dimension_semantics = [#tpu.dimension_semantics<parallel>], iteration_bounds = array<i64: 1>, scalar_prefetch = 0 : i64, scratch_operands = 0 : i64, tpu.core_type = #tpu.core_type<tc>, window_params = [{transform_indices = @transform_0, window_bounds = array<i64: 16, 16>}, {pipeline_mode = #tpu.pipeline_mode<synchronous>, transform_indices = @transform_1, window_bounds = array<i64: 16, 32>}, {pipeline_mode = #tpu.pipeline_mode<synchronous>, transform_indices = @transform_2, window_bounds = array<i64: 1, 32>}, {pipeline_mode = #tpu.pipeline_mode<synchronous>, transform_indices = @transform_3, window_bounds = array<i64: 32, 32>}, {pipeline_mode = #tpu.pipeline_mode<synchronous>, transform_indices = @transform_4, window_bounds = array<i64: 1, 32>}, {pipeline_mode = #tpu.pipeline_mode<synchronous>, transform_indices = @transform_5, window_bounds = array<i64: 32, 128>}, {pipeline_mode = #tpu.pipeline_mode<synchronous>, transform_indices = @transform_6, window_bounds = array<i64: 1, 128>}, {transform_indices = @transform_7, window_bounds = array<i64: 16, 128>}]} {
    %c0 = arith.constant 0 : index
    %c0_0 = arith.constant 0 : index
    %0 = vector.load %arg1[%c0, %c0_0] : memref<16x16xbf16, #tpu.memory_space<vmem>>, vector<16x16xbf16>
    %c0_1 = arith.constant 0 : index
    %c0_2 = arith.constant 0 : index
    %1 = vector.load %arg2[%c0_1, %c0_2] : memref<16x32xbf16, #tpu.memory_space<vmem>>, vector<16x32xbf16>
    %cst = arith.constant dense<0.000000e+00> : vector<16x32xf32>
    %2 = tpu.matmul %0, %1, %cst {dimension_numbers = #tpu.dot_dimension_numbers<[1], [0], [0], [1], [0, 0, 1, 1], [], []>} : vector<16x16xbf16>, vector<16x32xbf16>, vector<16x32xf32> -> vector<16x32xf32>
    %c0_3 = arith.constant 0 : index
    %c0_4 = arith.constant 0 : index
    %3 = vector.load %arg3[%c0_3, %c0_4] : memref<1x32xf32, #tpu.memory_space<vmem>>, vector<1x32xf32>
    %4 = vector.broadcast %3 : vector<1x32xf32> to vector<16x32xf32>
    %5 = arith.addf %2, %4 : vector<16x32xf32>
    %cst_5 = arith.constant 0.000000e+00 : f32
    %6 = vector.broadcast %cst_5 : f32 to vector<16x32xf32>
    %7 = arith.maximumf %5, %6 : vector<16x32xf32>
    %8 = arith.truncf %7 : vector<16x32xf32> to vector<16x32xbf16>
    %c0_6 = arith.constant 0 : index
    %c0_7 = arith.constant 0 : index
    %9 = vector.load %arg4[%c0_6, %c0_7] : memref<32x32xbf16, #tpu.memory_space<vmem>>, vector<32x32xbf16>
    %cst_8 = arith.constant dense<0.000000e+00> : vector<16x32xf32>
    %10 = tpu.matmul %8, %9, %cst_8 {dimension_numbers = #tpu.dot_dimension_numbers<[1], [0], [0], [1], [0, 0, 1, 1], [], []>} : vector<16x32xbf16>, vector<32x32xbf16>, vector<16x32xf32> -> vector<16x32xf32>
    %c0_9 = arith.constant 0 : index
    %c0_10 = arith.constant 0 : index
    %11 = vector.load %arg5[%c0_9, %c0_10] : memref<1x32xf32, #tpu.memory_space<vmem>>, vector<1x32xf32>
    %12 = vector.broadcast %11 : vector<1x32xf32> to vector<16x32xf32>
    %13 = arith.addf %10, %12 : vector<16x32xf32>
    %cst_11 = arith.constant 0.000000e+00 : f32
    %14 = vector.broadcast %cst_11 : f32 to vector<16x32xf32>
    %15 = arith.maximumf %13, %14 : vector<16x32xf32>
    %16 = arith.truncf %15 : vector<16x32xf32> to vector<16x32xbf16>
    %c0_12 = arith.constant 0 : index
    %c0_13 = arith.constant 0 : index
    %17 = vector.load %arg6[%c0_12, %c0_13] : memref<32x128xbf16, #tpu.memory_space<vmem>>, vector<32x128xbf16>
    %cst_14 = arith.constant dense<0.000000e+00> : vector<16x128xf32>
    %18 = tpu.matmul %16, %17, %cst_14 {dimension_numbers = #tpu.dot_dimension_numbers<[1], [0], [0], [1], [0, 0, 1, 1], [], []>} : vector<16x32xbf16>, vector<32x128xbf16>, vector<16x128xf32> -> vector<16x128xf32>
    %c0_15 = arith.constant 0 : index
    %c0_16 = arith.constant 0 : index
    %19 = vector.load %arg7[%c0_15, %c0_16] : memref<1x128xf32, #tpu.memory_space<vmem>>, vector<1x128xf32>
    %20 = vector.broadcast %19 : vector<1x128xf32> to vector<16x128xf32>
    %21 = arith.addf %18, %20 : vector<16x128xf32>
    %22 = math.tanh %21 : vector<16x128xf32>
    %cst_17 = arith.constant 2.000000e+00 : f32
    %23 = vector.broadcast %cst_17 : f32 to vector<16x128xf32>
    %24 = arith.mulf %22, %23 : vector<16x128xf32>
    %c0_18 = arith.constant 0 : index
    %c0_19 = arith.constant 0 : index
    %25 = vector.load %arg8[%c0_18, %c0_19] : memref<16x128xf32, #tpu.memory_space<vmem>>, vector<16x128xf32>
    tpu.vector_store %arg8[%c0_18, %c0_19], %24 {strides = array<i32>} : memref<16x128xf32, #tpu.memory_space<vmem>>, vector<16x128xf32>,
    return
  }
  func.func @transform_0(%arg0: i32) -> (i32, i32) {
    %c0_i32 = arith.constant 0 : i32
    %c0_i32_0 = arith.constant 0 : i32
    return %arg0, %c0_i32 : i32, i32
  }
  func.func @transform_1(%arg0: i32) -> (i32, i32) {
    %c0_i32 = arith.constant 0 : i32
    %c0_i32_0 = arith.constant 0 : i32
    %c0_i32_1 = arith.constant 0 : i32
    return %c0_i32, %c0_i32_0 : i32, i32
  }
  func.func @transform_2(%arg0: i32) -> (i32, i32) {
    %c0_i32 = arith.constant 0 : i32
    %c0_i32_0 = arith.constant 0 : i32
    %c0_i32_1 = arith.constant 0 : i32
    return %c0_i32, %c0_i32_0 : i32, i32
  }
  func.func @transform_3(%arg0: i32) -> (i32, i32) {
    %c0_i32 = arith.constant 0 : i32
    %c0_i32_0 = arith.constant 0 : i32
    %c0_i32_1 = arith.constant 0 : i32
    return %c0_i32, %c0_i32_0 : i32, i32
  }
  func.func @transform_4(%arg0: i32) -> (i32, i32) {
    %c0_i32 = arith.constant 0 : i32
    %c0_i32_0 = arith.constant 0 : i32
    %c0_i32_1 = arith.constant 0 : i32
    return %c0_i32, %c0_i32_0 : i32, i32
  }
  func.func @transform_5(%arg0: i32) -> (i32, i32) {
    %c0_i32 = arith.constant 0 : i32
    %c0_i32_0 = arith.constant 0 : i32
    %c0_i32_1 = arith.constant 0 : i32
    return %c0_i32, %c0_i32_0 : i32, i32
  }
  func.func @transform_6(%arg0: i32) -> (i32, i32) {
    %c0_i32 = arith.constant 0 : i32
    %c0_i32_0 = arith.constant 0 : i32
    %c0_i32_1 = arith.constant 0 : i32
    return %c0_i32, %c0_i32_0 : i32, i32
  }
  func.func @transform_7(%arg0: i32) -> (i32, i32) {
    %c0_i32 = arith.constant 0 : i32
    %c0_i32_0 = arith.constant 0 : i32
    return %arg0, %c0_i32 : i32, i32
  }
}

</mosaic_0001>

<bundles_post_ra>
// kernel: tpu_custom_call.1
= control target key start
LH: loop header
LB: loop body
LE: loop exit
PB: predicated region body
PF: predicated region fallthrough
CT: control target
= control target key end

     0   :  { %12 = vsyncpa [#allocation3], 0  ;;  %s588_s0 = inlined_call_operand.hbm [shape: bf16[16,16], index: 0, kind: input, shape index: {}]   ;;  %s589_s1 = inlined_call_operand.hbm [shape: bf16[16,32], index: 1, kind: input, shape index: {}]   ;;  %s590_s2 = inlined_call_operand.vmem [shape: f32[1,32], index: 2, kind: input, shape index: {}]   ;;  %s591_s3 = inlined_call_operand.hbm [shape: bf16[32,32], index: 3, kind: input, shape index: {}]   ;;  %s592_s4 = inlined_call_operand.vmem [shape: f32[1,32], index: 4, kind: input, shape index: {}]   ;;  %s593_s5 = inlined_call_operand.vmem [shape: bf16[32,128], index: 5, kind: input, shape index: {}]   ;;  %s594_s6 = inlined_call_operand.vmem [shape: f32[1,128], index: 6, kind: input, shape index: {}]   ;;  %s595_s7 = inlined_call_operand.hbm [shape: f32[16,128], index: 7, kind: output, shape index: {}]  }
   0x1   :  { %13 = vsyncpa [#allocation6], 0 }
   0x2   :  { %14 = vsyncpa [#allocation4], 0  ;;  %s457_s24 = smov [#allocation5]   ;;  %s458_s26 = smov [#allocation2]  }
   0x3   :  { %s32_s25 = sshll.u32 %s457_s24, 4  ;;  %s20_s27 = sshll.u32 %s458_s26, 4  ;;  %s33_s25 = int_to_ptr.vmem [resolvable:$true] %s32_s25  ;;  %s507_s27 = int_to_ptr.vmem [resolvable:$true] %s20_s27 }
   0x4   :  { %s363_s30 = scalar_lea.hbm %s589_s1, 128 }
   0x5   :  { %p364_p0 = scmp.ne.s32.totalorder %s589_s1, %s363_s30  ;;  %p367_p1 = scmp.lt.u32.totalorder %s363_s30, %s589_s1 }
   0x7   :  { %p369_p2 = pnand %p367_p1, %p364_p0 }
   0x9   :  { %372 = shalt.err (!%p369_p2)
}
   0xa   :  { %s373_s12 = scalar_lea.vmem %s33_s25, 128  ;;  %p378_p4 = scmp.lt.s32.totalorder %s33_s25, %s33_s25 }
   0xb   :  { %p374_p3 = scmp.ne.s32.totalorder %s33_s25, %s373_s12  ;;  %p379_p5 = scmp.lt.s32.totalorder %s373_s12, %s373_s12 }
   0xd   :  { %p380_p6 = por %p379_p5, %p378_p4 }
   0xf   :  { %p381_p7 = pnand %p380_p6, %p374_p3 }
  0x11   :  { %384 = shalt.err (!%p381_p7)
}
  0x12   :  { %s459_s13 = smov 64   ;;  %s460_s14 = smov 4  }
  0x13   :  { %38 = dma.hbm_to_vmem [thread:$0]  %s589_s1, 128, %s33_s25, [#allocation6], %s459_s13, %s459_s13, %s460_s14  }
  0x14   :  { %s385_s19 = scalar_lea.hbm %s588_s0, 128 }
  0x15   :  { %p386_p8 = scmp.ne.s32.totalorder %s588_s0, %s385_s19  ;;  %p389_p9 = scmp.lt.u32.totalorder %s385_s19, %s588_s0 }
  0x17   :  { %p391_p10 = pnand %p389_p9, %p386_p8 }
  0x19   :  { %394 = shalt.err (!%p391_p10)
}
  0x1a   :  { %s395_s24 = scalar_lea.vmem %s507_s27, 128  ;;  %p400_p12 = scmp.lt.s32.totalorder %s507_s27, %s507_s27 }
  0x1b   :  { %p396_p11 = scmp.ne.s32.totalorder %s507_s27, %s395_s24  ;;  %p401_p13 = scmp.lt.s32.totalorder %s395_s24, %s395_s24 }
  0x1d   :  { %p402_p0 = por %p401_p13, %p400_p12 }
  0x1f   :  { %p403_p1 = pnand %p402_p0, %p396_p11 }
  0x21   :  { %406 = shalt.err (!%p403_p1)
}
  0x22   :  { %26 = dma.hbm_to_vmem [thread:$0]  %s588_s0, 128, %s507_s27, [#allocation3], %s459_s13, %s459_s13, %s460_s14  }
  0x23   :  { %s461_s26 = smov [#allocation7]   ;;  %s407_s8 = scalar_lea.hbm %s591_s3, 256 }
  0x24   :  { %s46_s28 = sshll.u32 %s461_s26, 4  ;;  %p408_p2 = scmp.ne.s32.totalorder %s591_s3, %s407_s8  ;;  %s47_s28 = int_to_ptr.vmem [resolvable:$true] %s46_s28 }
  0x25   :  { %p411_p3 = scmp.lt.u32.totalorder %s407_s8, %s591_s3 }
  0x27   :  { %p413_p4 = pnand %p411_p3, %p408_p2 }
  0x29   :  { %416 = shalt.err (!%p413_p4)
}
  0x2a   :  { %s417_s15 = scalar_lea.vmem %s47_s28, 256  ;;  %p422_p6 = scmp.lt.s32.totalorder %s47_s28, %s47_s28 }
  0x2b   :  { %p418_p5 = scmp.ne.s32.totalorder %s47_s28, %s417_s15  ;;  %p423_p7 = scmp.lt.s32.totalorder %s417_s15, %s417_s15 }
  0x2d   :  { %p424_p8 = por %p423_p7, %p422_p6 }
  0x2f   :  { %p425_p9 = pnand %p424_p8, %p418_p5 }
  0x31   :  { %428 = shalt.err (!%p425_p9)
}
  0x32   :  { %52 = dma.hbm_to_vmem [thread:$0]  %s591_s3, 256, %s47_s28, [#allocation6], %s459_s13, %s459_s13, %s460_s14  }
  0x33   :  { %451 = dma.done.wait [#allocation3], 128  }
  0x34   :  { %452 = vsyncadd [#allocation3], 4294967168 }
  0x35   :  { %453 = dma.done.wait [#allocation6], 384  }
  0x36   :  { %454 = vsyncadd [#allocation6], 4294966912  ;;  %v462_v0 = vmov 0.0   ;;  %vm463_vm0 = vmmov 0   ;;  %v353_v1 = vld [vmem:[#allocation5] sm:$0xff]   ;;  %v354_v2 = vld [vmem:[#allocation2] sm:$0xff]  }
  0x37   :  { %321 = vmatprep.subr.bf16.mxu0 %v462_v0  ;;  %323 = vmatprep.mubr.msk.bf16.mxu0 %vm463_vm0, %v462_v0  ;;  %vm91_vm1 = vcmask 130048   ;;  %v355_v3 = vld [vmem:[#allocation7] sm:$0xff]   ;;  %v356_v4 = vld [vmem:[#allocation7 + $0x8] sm:$0xff]   ;;  %vm162_vm2 = vcmask 261120  }
  0x38   :  { %327 = vmatprep.subr.bf16.mxu1 %v462_v0  ;;  %331 = vmatprep.mubr.msk.bf16.mxu1 %vm463_vm0, %v462_v0  ;;  %v301_v5 = vld [vmem:[%s590_s2] ss:$0 sm:$0xff]  ;;  %v358_v16 = vld [vmem:[%s593_s5 + $0x8] sm:$0xff]  }
  0x39   :  { %322 = vmatpush3.bf16.msra.mxu0 %v353_v1  ;;  %328 = vmatpush3.bf16.msra.mxu1 %v355_v3  ;;  %v357_v15 = vld [vmem:[%s593_s5] sm:$0xff]  }
  0x3a   :  { %335 = vmatprep.subr.bf16.mxu0 %v462_v0  ;;  %329 = vmatprep.subr.bf16.mxu1 %v462_v0  ;;  %v305_v17 = vld [vmem:[%s592_s4] ss:$0 sm:$0xff]  ;;  %s464_s4 = smov [#allocation8]  }
  0x3b   :  { %v309_v27 = vld [vmem:[%s594_s6] ss:$0 sm:$0xff]  ;;  %s288_s5 = sshll.u32 %s464_s4, 4  ;;  %s289_s5 = int_to_ptr.vmem [resolvable:$true] %s288_s5 }
  0x3c   :  { %324 = vmatmul.mubr.msk.bf16.vlgmr.msra.gmra.mrb[0].mxu0 %vm91_vm1, %v354_v2  ;;  %s429_s22 = scalar_lea.vmem %s289_s5, 256  ;;  %p434_p11 = scmp.lt.s32.totalorder %s289_s5, %s289_s5 }
  0x3d   :  { %339 = vmatprep.mubr.msk.bf16.mxu0 %vm463_vm0, %v462_v0  ;;  %330 = vmatpush3.bf16.msra.mxu1 %v356_v4  ;;  %p430_p10 = scmp.ne.s32.totalorder %s289_s5, %s429_s22  ;;  %p435_p12 = scmp.lt.s32.totalorder %s429_s22, %s429_s22 }
  0x3e   :  { %336 = vmatpush3.bf16.msra.mxu0 %v357_v15 }
  0x3f   :  { %337 = vmatprep.subr.bf16.mxu0 %v462_v0  ;;  %p436_p13 = por %p435_p12, %p434_p11 }
  0x41   :  { %p437_p0 = pnand %p436_p13, %p430_p10 }
  0x42   :  { %338 = vmatpush3.bf16.msra.mxu0 %v358_v16 }
 0x10f   :  { %v129_v6 = vpop.f32.mrb[0].mxu0 }
 0x110   :  { %v130_v7 = vadd.f32 %v301_v5, %v129_v6  ;;  %v325_v8 = vpop.f32.mrb[1].mxu0 }
 0x111   :  { %v132_v9 = vpop.f32.mrb[2].mxu0 }
 0x112   :  { %v133_v10 = vadd.f32 %v301_v5, %v132_v9  ;;  %v326_v11 = vpop.f32.mrb[3].mxu0  ;;  %v136_v12 = vmax.f32 %v130_v7, 0.0 }
 0x114   :  { %v137_v13 = vmax.f32 %v133_v10, 0.0 }
 0x116   :  { %v138_v14 = vpack.c.bf16 %v137_v13, %v136_v12 }
 0x118   :  { %332 = vmatmul.mubr.msk.bf16.vlgmr.msra.gmra.mrb[0].mxu1 %vm162_vm2, %v138_v14 }
 0x1eb   :  { %v200_v18 = vpop.f32.mrb[0].mxu1 }
 0x1ec   :  { %v201_v19 = vadd.f32 %v305_v17, %v200_v18  ;;  %v333_v20 = vpop.f32.mrb[1].mxu1 }
 0x1ed   :  { %v203_v21 = vpop.f32.mrb[2].mxu1 }
 0x1ee   :  { %v204_v22 = vadd.f32 %v305_v17, %v203_v21  ;;  %v334_v23 = vpop.f32.mrb[3].mxu1  ;;  %v207_v24 = vmax.f32 %v201_v19, 0.0 }
 0x1f0   :  { %v208_v25 = vmax.f32 %v204_v22, 0.0 }
 0x1f2   :  { %v209_v26 = vpack.c.bf16 %v208_v25, %v207_v24 }
 0x1f4   :  { %340 = vmatmul.mubr.msk.bf16.vlgmr.msra.gmra.mrb[4].mxu0 %vm162_vm2, %v209_v26 }
 0x2c7   :  { %v270_v28 = vpop.f32.mrb[4].mxu0 }
 0x2c8   :  { %v271_v29 = vadd.f32 %v309_v27, %v270_v28  ;;  %v341_v30 = vpop.f32.mrb[5].mxu0 }
 0x2c9   :  { %v273_v31 = vpop.f32.mrb[6].mxu0 }
 0x2ca   :  { %359 = vtanh.f32 %v271_v29  ;;  %v274_v32 = vadd.f32 %v309_v27, %v273_v31  ;;  %v342_v33 = vpop.f32.mrb[7].mxu0 }
 0x2cc   :  { %361 = vtanh.f32 %v274_v32 }
 0x2d4   :  { %v360_v34 = vpop.eup %359 }
 0x2d5   :  { %v279_v35 = vmul.f32 2.0, %v360_v34 }
 0x2d6   :  { %v362_v36 = vpop.eup %361 }
 0x2d7   :  { %281 = vst [vmem:[#allocation8] sm:$0xff] %v279_v35  ;;  %v280_v37 = vmul.f32 2.0, %v362_v36 }
 0x2d9   :  { %282 = vst [vmem:[#allocation8 + $0x8] sm:$0xff] %v280_v37 }
 0x2da   :  { %440 = shalt.err (!%p437_p0)
}
 0x2db   :  { %s441_s24 = scalar_lea.hbm %s595_s7, 256 }
 0x2dc   :  { %p442_p1 = scmp.ne.s32.totalorder %s595_s7, %s441_s24  ;;  %p445_p2 = scmp.lt.u32.totalorder %s441_s24, %s595_s7 }
 0x2de   :  { %p447_p3 = pnand %p445_p2, %p442_p1 }
 0x2e0   :  { %450 = shalt.err (!%p447_p3)
}
 0x2e1   :  { %s465_s29 = smov 128   ;;  %s466_s30 = smov 8  }
 0x2e2   :  { %294 = dma.vmem_to_hbm [thread:$0]  %s289_s5, 256, %s595_s7, [#allocation4], %s465_s29, %s465_s29, %s466_s30  }
 0x2e3   :  { %455 = dma.done.wait [#allocation4], 256  }
 0x2e4   :  { %456 = vsyncadd [#allocation4], 4294967040 }
 0x2e5   :  { %298 = vsyncpa [#allocation3], 1 }
 0x2e6   :  { %299 = vsyncpa [#allocation6], 1 }
 0x2e7   :  { %300 = vsyncpa [#allocation4], 1 }

// kernel: tpu_custom_call.1
= control target key start
LH: loop header
LB: loop body
LE: loop exit
PB: predicated region body
PF: predicated region fallthrough
CT: control target
= control target key end

     0   :  { %12 = vsyncpa [#allocation3], 0  ;;  %s588_s0 = inlined_call_operand.hbm [shape: bf16[16,16], index: 0, kind: input, shape index: {}]   ;;  %s589_s1 = inlined_call_operand.hbm [shape: bf16[16,32], index: 1, kind: input, shape index: {}]   ;;  %s590_s2 = inlined_call_operand.vmem [shape: f32[1,32], index: 2, kind: input, shape index: {}]   ;;  %s591_s3 = inlined_call_operand.hbm [shape: bf16[32,32], index: 3, kind: input, shape index: {}]   ;;  %s592_s4 = inlined_call_operand.vmem [shape: f32[1,32], index: 4, kind: input, shape index: {}]   ;;  %s593_s5 = inlined_call_operand.vmem [shape: bf16[32,128], index: 5, kind: input, shape index: {}]   ;;  %s594_s6 = inlined_call_operand.vmem [shape: f32[1,128], index: 6, kind: input, shape index: {}]   ;;  %s595_s7 = inlined_call_operand.hbm [shape: f32[16,128], index: 7, kind: output, shape index: {}]  }
   0x1   :  { %13 = vsyncpa [#allocation6], 0 }
   0x2   :  { %14 = vsyncpa [#allocation4], 0  ;;  %s457_s24 = smov [#allocation5]   ;;  %s458_s26 = smov [#allocation2]  }
   0x3   :  { %s32_s25 = sshll.u32 %s457_s24, 4  ;;  %s20_s27 = sshll.u32 %s458_s26, 4  ;;  %s33_s25 = int_to_ptr.vmem [resolvable:$true] %s32_s25  ;;  %s507_s27 = int_to_ptr.vmem [resolvable:$true] %s20_s27 }
   0x4   :  { %s363_s30 = scalar_lea.hbm %s589_s1, 128 }
   0x5   :  { %p364_p0 = scmp.ne.s32.totalorder %s589_s1, %s363_s30  ;;  %p367_p1 = scmp.lt.u32.totalorder %s363_s30, %s589_s1 }
   0x7   :  { %p369_p2 = pnand %p367_p1, %p364_p0 }
   0x9   :  { %372 = shalt.err (!%p369_p2)
}
   0xa   :  { %s373_s12 = scalar_lea.vmem %s33_s25, 128  ;;  %p378_p4 = scmp.lt.s32.totalorder %s33_s25, %s33_s25 }
   0xb   :  { %p374_p3 = scmp.ne.s32.totalorder %s33_s25, %s373_s12  ;;  %p379_p5 = scmp.lt.s32.totalorder %s373_s12, %s373_s12 }
   0xd   :  { %p380_p6 = por %p379_p5, %p378_p4 }
   0xf   :  { %p381_p7 = pnand %p380_p6, %p374_p3 }
  0x11   :  { %384 = shalt.err (!%p381_p7)
}
  0x12   :  { %s459_s13 = smov 64   ;;  %s460_s14 = smov 4  }
  0x13   :  { %38 = dma.hbm_to_vmem [thread:$0]  %s589_s1, 128, %s33_s25, [#allocation6], %s459_s13, %s459_s13, %s460_s14  }
  0x14   :  { %s385_s19 = scalar_lea.hbm %s588_s0, 128 }
  0x15   :  { %p386_p8 = scmp.ne.s32.totalorder %s588_s0, %s385_s19  ;;  %p389_p9 = scmp.lt.u32.totalorder %s385_s19, %s588_s0 }
  0x17   :  { %p391_p10 = pnand %p389_p9, %p386_p8 }
  0x19   :  { %394 = shalt.err (!%p391_p10)
}
  0x1a   :  { %s395_s24 = scalar_lea.vmem %s507_s27, 128  ;;  %p400_p12 = scmp.lt.s32.totalorder %s507_s27, %s507_s27 }
  0x1b   :  { %p396_p11 = scmp.ne.s32.totalorder %s507_s27, %s395_s24  ;;  %p401_p13 = scmp.lt.s32.totalorder %s395_s24, %s395_s24 }
  0x1d   :  { %p402_p0 = por %p401_p13, %p400_p12 }
  0x1f   :  { %p403_p1 = pnand %p402_p0, %p396_p11 }
  0x21   :  { %406 = shalt.err (!%p403_p1)
}
  0x22   :  { %26 = dma.hbm_to_vmem [thread:$0]  %s588_s0, 128, %s507_s27, [#allocation3], %s459_s13, %s459_s13, %s460_s14  }
  0x23   :  { %s461_s26 = smov [#allocation7]   ;;  %s407_s8 = scalar_lea.hbm %s591_s3, 256 }
  0x24   :  { %s46_s28 = sshll.u32 %s461_s26, 4  ;;  %p408_p2 = scmp.ne.s32.totalorder %s591_s3, %s407_s8  ;;  %s47_s28 = int_to_ptr.vmem [resolvable:$true] %s46_s28 }
  0x25   :  { %p411_p3 = scmp.lt.u32.totalorder %s407_s8, %s591_s3 }
  0x27   :  { %p413_p4 = pnand %p411_p3, %p408_p2 }
  0x29   :  { %416 = shalt.err (!%p413_p4)
}
  0x2a   :  { %s417_s15 = scalar_lea.vmem %s47_s28, 256  ;;  %p422_p6 = scmp.lt.s32.totalorder %s47_s28, %s47_s28 }
  0x2b   :  { %p418_p5 = scmp.ne.s32.totalorder %s47_s28, %s417_s15  ;;  %p423_p7 = scmp.lt.s32.totalorder %s417_s15, %s417_s15 }
  0x2d   :  { %p424_p8 = por %p423_p7, %p422_p6 }
  0x2f   :  { %p425_p9 = pnand %p424_p8, %p418_p5 }
  0x31   :  { %428 = shalt.err (!%p425_p9)
}
  0x32   :  { %52 = dma.hbm_to_vmem [thread:$0]  %s591_s3, 256, %s47_s28, [#allocation6], %s459_s13, %s459_s13, %s460_s14  }
  0x33   :  { %451 = dma.done.wait [#allocation3], 128  }
  0x34   :  { %452 = vsyncadd [#allocation3], 4294967168 }
  0x35   :  { %453 = dma.done.wait [#allocation6], 384  }
  0x36   :  { %454 = vsyncadd [#allocation6], 4294966912  ;;  %v462_v0 = vmov 0.0   ;;  %vm463_vm0 = vmmov 0   ;;  %v353_v1 = vld [vmem:[#allocation5] sm:$0xff]   ;;  %v354_v2 = vld [vmem:[#allocation2] sm:$0xff]  }
  0x37   :  { %321 = vmatprep.subr.bf16.mxu0 %v462_v0  ;;  %323 = vmatprep.mubr.msk.bf16.mxu0 %vm463_vm0, %v462_v0  ;;  %vm91_vm1 = vcmask 130048   ;;  %v355_v3 = vld [vmem:[#allocation7] sm:$0xff]   ;;  %v356_v4 = vld [vmem:[#allocation7 + $0x8] sm:$0xff]   ;;  %vm162_vm2 = vcmask 261120  }
  0x38   :  { %327 = vmatprep.subr.bf16.mxu1 %v462_v0  ;;  %331 = vmatprep.mubr.msk.bf16.mxu1 %vm463_vm0, %v462_v0  ;;  %v301_v5 = vld [vmem:[%s590_s2] ss:$0 sm:$0xff]  ;;  %v358_v16 = vld [vmem:[%s593_s5 + $0x8] sm:$0xff]  }
  0x39   :  { %322 = vmatpush3.bf16.msra.mxu0 %v353_v1  ;;  %328 = vmatpush3.bf16.msra.mxu1 %v355_v3  ;;  %v357_v15 = vld [vmem:[%s593_s5] sm:$0xff]  }
  0x3a   :  { %335 = vmatprep.subr.bf16.mxu0 %v462_v0  ;;  %329 = vmatprep.subr.bf16.mxu1 %v462_v0  ;;  %v305_v17 = vld [vmem:[%s592_s4] ss:$0 sm:$0xff]  ;;  %s464_s4 = smov [#allocation8]  }
  0x3b   :  { %v309_v27 = vld [vmem:[%s594_s6] ss:$0 sm:$0xff]  ;;  %s288_s5 = sshll.u32 %s464_s4, 4  ;;  %s289_s5 = int_to_ptr.vmem [resolvable:$true] %s288_s5 }
  0x3c   :  { %324 = vmatmul.mubr.msk.bf16.vlgmr.msra.gmra.mrb[0].mxu0 %vm91_vm1, %v354_v2  ;;  %s429_s22 = scalar_lea.vmem %s289_s5, 256  ;;  %p434_p11 = scmp.lt.s32.totalorder %s289_s5, %s289_s5 }
  0x3d   :  { %339 = vmatprep.mubr.msk.bf16.mxu0 %vm463_vm0, %v462_v0  ;;  %330 = vmatpush3.bf16.msra.mxu1 %v356_v4  ;;  %p430_p10 = scmp.ne.s32.totalorder %s289_s5, %s429_s22  ;;  %p435_p12 = scmp.lt.s32.totalorder %s429_s22, %s429_s22 }
  0x3e   :  { %336 = vmatpush3.bf16.msra.mxu0 %v357_v15 }
  0x3f   :  { %337 = vmatprep.subr.bf16.mxu0 %v462_v0  ;;  %p436_p13 = por %p435_p12, %p434_p11 }
  0x41   :  { %p437_p0 = pnand %p436_p13, %p430_p10 }
  0x42   :  { %338 = vmatpush3.bf16.msra.mxu0 %v358_v16 }
 0x10f   :  { %v129_v6 = vpop.f32.mrb[0].mxu0 }
 0x110   :  { %v130_v7 = vadd.f32 %v301_v5, %v129_v6  ;;  %v325_v8 = vpop.f32.mrb[1].mxu0 }
 0x111   :  { %v132_v9 = vpop.f32.mrb[2].mxu0 }
 0x112   :  { %v133_v10 = vadd.f32 %v301_v5, %v132_v9  ;;  %v326_v11 = vpop.f32.mrb[3].mxu0  ;;  %v136_v12 = vmax.f32 %v130_v7, 0.0 }
 0x114   :  { %v137_v13 = vmax.f32 %v133_v10, 0.0 }
 0x116   :  { %v138_v14 = vpack.c.bf16 %v137_v13, %v136_v12 }
 0x118   :  { %332 = vmatmul.mubr.msk.bf16.vlgmr.msra.gmra.mrb[0].mxu1 %vm162_vm2, %v138_v14 }
 0x1eb   :  { %v200_v18 = vpop.f32.mrb[0].mxu1 }
 0x1ec   :  { %v201_v19 = vadd.f32 %v305_v17, %v200_v18  ;;  %v333_v20 = vpop.f32.mrb[1].mxu1 }
 0x1ed   :  { %v203_v21 = vpop.f32.mrb[2].mxu1 }
 0x1ee   :  { %v204_v22 = vadd.f32 %v305_v17, %v203_v21  ;;  %v334_v23 = vpop.f32.mrb[3].mxu1  ;;  %v207_v24 = vmax.f32 %v201_v19, 0.0 }
 0x1f0   :  { %v208_v25 = vmax.f32 %v204_v22, 0.0 }
 0x1f2   :  { %v209_v26 = vpack.c.bf16 %v208_v25, %v207_v24 }
 0x1f4   :  { %340 = vmatmul.mubr.msk.bf16.vlgmr.msra.gmra.mrb[4].mxu0 %vm162_vm2, %v209_v26 }
 0x2c7   :  { %v270_v28 = vpop.f32.mrb[4].mxu0 }
 0x2c8   :  { %v271_v29 = vadd.f32 %v309_v27, %v270_v28  ;;  %v341_v30 = vpop.f32.mrb[5].mxu0 }
 0x2c9   :  { %v273_v31 = vpop.f32.mrb[6].mxu0 }
 0x2ca   :  { %359 = vtanh.f32 %v271_v29  ;;  %v274_v32 = vadd.f32 %v309_v27, %v273_v31  ;;  %v342_v33 = vpop.f32.mrb[7].mxu0 }
 0x2cc   :  { %361 = vtanh.f32 %v274_v32 }
 0x2d4   :  { %v360_v34 = vpop.eup %359 }
 0x2d5   :  { %v279_v35 = vmul.f32 2.0, %v360_v34 }
 0x2d6   :  { %v362_v36 = vpop.eup %361 }
 0x2d7   :  { %281 = vst [vmem:[#allocation8] sm:$0xff] %v279_v35  ;;  %v280_v37 = vmul.f32 2.0, %v362_v36 }
 0x2d9   :  { %282 = vst [vmem:[#allocation8 + $0x8] sm:$0xff] %v280_v37 }
 0x2da   :  { %440 = shalt.err (!%p437_p0)
}
 0x2db   :  { %s441_s24 = scalar_lea.hbm %s595_s7, 256 }
 0x2dc   :  { %p442_p1 = scmp.ne.s32.totalorder %s595_s7, %s441_s24  ;;  %p445_p2 = scmp.lt.u32.totalorder %s441_s24, %s595_s7 }
 0x2de   :  { %p447_p3 = pnand %p445_p2, %p442_p1 }
 0x2e0   :  { %450 = shalt.err (!%p447_p3)
}
 0x2e1   :  { %s465_s29 = smov 128   ;;  %s466_s30 = smov 8  }
 0x2e2   :  { %294 = dma.vmem_to_hbm [thread:$0]  %s289_s5, 256, %s595_s7, [#allocation4], %s465_s29, %s465_s29, %s466_s30  }
 0x2e3   :  { %455 = dma.done.wait [#allocation4], 256  }
 0x2e4   :  { %456 = vsyncadd [#allocation4], 4294967040 }
 0x2e5   :  { %298 = vsyncpa [#allocation3], 1 }
 0x2e6   :  { %299 = vsyncpa [#allocation6], 1 }
 0x2e7   :  { %300 = vsyncpa [#allocation4], 1 }

</bundles_post_ra>
